<compile_context>
chip_gen: v6e
topology: v6e:2x2x1
jax: 0.10.0
libtpu: 0.0.40
codegen_flags: <defaults>
</compile_context>

<pallas_src>
import functools

import jax
import jax.numpy as jnp
from jax import lax
from jax.experimental import pallas as pl
from jax.experimental.pallas import tpu as pltpu


def _round_up(v, m):
    return ((v + m - 1) // m) * m


def _vmem_capacity_bytes():
    """Physical per-TensorCore VMEM (v5e/v6e: 128 MiB, v7x: 64 MiB)."""
    try:
        cap = getattr(pltpu.get_tpu_info(), "vmem_capacity_bytes", None)
        if cap:
            return int(cap)
    except Exception:
        pass
    return 64 << 20  # conservative (v7x-sized) default if the query is unavailable


def _select_chunk(hw, c_pad_rows, dtype_bytes, vmem_cap):
    """Largest multiple-of-128 chunk whose double-buffered x block fits a
    VMEM budget of ~half the physical VMEM.  Prefers exact divisors of hw so
    the wrapper does not have to zero-pad (which costs an HBM copy)."""
    x_budget = vmem_cap // 2                     # total for the x double buffer
    bytes_per_lane = max(1, c_pad_rows * dtype_bytes)
    max_lanes = max(128, ((x_budget // 2) // bytes_per_lane) // 128 * 128)
    if hw <= max_lanes:
        return _round_up(hw, 128)                # single (padded) chunk
    c = max_lanes
    while c >= 128:
        if hw % c == 0:
            return c                             # divisor: no padding needed
        c -= 128
    return max_lanes                             # no divisor: wrapper zero-pads


def _dyrelu_coefs_kernel(x_ref, w1t_ref, b1_ref, w2t_ref, b2_ref,
                         out_ref, acc_ref, *, inv_hw, n_slab, unroll):
    """Streamed global-avg-pool + tiny MLP head (one batch row per parallel
    grid index).

    x_ref:   (1, C, chunk)   current spatial chunk (native dtype, lane-dense)
    w1t_ref: (C, hid)        fc1 weight, pre-transposed
    b1_ref:  (1, hid)
    w2t_ref: (hid, 2k)       fc2 weight, pre-transposed
    b2_ref:  (1, 2k)
    out_ref: (1, 1, 2k)
    acc_ref: (1, C, 128) f32 lane-partial running sum (scratch, persists
                             across the reduction grid axis)
    """
    j = pl.program_id(1)

    @pl.when(j == 0)
    def _init():
        acc_ref[...] = jnp.zeros_like(acc_ref)

    # VPU-partial accumulation: add 128-lane slabs of the chunk into the
    # lane-partial f32 accumulator.  No full-block f32 materialization and no
    # per-step cross-lane (XLU) reduce.
    def slab_body(s, carry):
        start = pl.multiple_of(s * 128, 128)
        acc_ref[...] += x_ref[:, :, pl.ds(start, 128)].astype(jnp.float32)
        return carry

    lax.fori_loop(0, n_slab, slab_body, 0, unroll=unroll)

    @pl.when(j == pl.num_programs(1) - 1)
    def _finalize():
        # Single cross-lane reduce, then the tiny MLP head.
        theta = jnp.sum(acc_ref[...], axis=-1) * inv_hw                     # (1, C)
        h = jnp.dot(theta, w1t_ref[...], preferred_element_type=jnp.float32)
        h = jnp.maximum(h + b1_ref[...], 0.0)                               # (1, hid)
        t = jnp.dot(h, w2t_ref[...], preferred_element_type=jnp.float32)
        t = t + b2_ref[...]                                                 # (1, 2k)
        # 2*sigmoid(t) - 1 == tanh(t/2): one EUP op instead of exp/recip chain.
        out_ref[...] = jnp.tanh(0.5 * t).reshape(out_ref.shape).astype(out_ref.dtype)


def dyrelu_get_relu_coefs(x, w1, b1, w2, b2, *, chunk=None):
    """x: (B, C, H, W) any float dtype; w1: (hid, C); b1: (hid,);
    w2: (2k, hid); b2: (2k,). Returns (B, 2k) f32 coefficients."""
    B, C, H, W = x.shape
    HW = H * W
    hid = w1.shape[0]
    two_k = w2.shape[0]

    dtype_bytes = jnp.dtype(x.dtype).itemsize
    # Sublane tile of the (C, chunk) block in VMEM: 8 rows for 32-bit dtypes,
    # 16 for 16-bit, 32 for 8-bit (accounts for packing padding in the budget).
    sublane_pack = 8 * max(1, 4 // dtype_bytes)
    c_pad = _round_up(C, sublane_pack)

    vmem_cap = _vmem_capacity_bytes()
    if chunk is None:
        chunk = _select_chunk(HW, c_pad, dtype_bytes, vmem_cap)
    assert chunk >= 128 and chunk % 128 == 0, "chunk must be a multiple of 128 lanes"

    hw_pad = _round_up(HW, chunk)
    n_chunks = hw_pad // chunk
    n_slab = chunk // 128

    # Lane-dense layout; keep native dtype (no wrapper upcast of the big operand).
    x3 = x.reshape(B, C, HW)
    if hw_pad != HW:
        # Zero padding is sum-neutral (we divide by the true H*W).  Costs one
        # extra HBM copy; _select_chunk prefers exact divisors to avoid it.
        x3 = jnp.pad(x3, ((0, 0), (0, 0), (0, hw_pad - HW)))

    # Pre-transpose the tiny FC weights host-side (no in-kernel XLU transpose).
    w1t = jnp.asarray(w1, jnp.float32).T           # (C, hid)
    w2t = jnp.asarray(w2, jnp.float32).T           # (hid, 2k)
    b1r = jnp.asarray(b1, jnp.float32).reshape(1, hid)
    b2r = jnp.asarray(b2, jnp.float32).reshape(1, two_k)

    kernel = functools.partial(
        _dyrelu_coefs_kernel,
        inv_hw=float(1.0 / HW),
        n_slab=n_slab,
        unroll=min(8, n_slab),
    )

    # Scoped-VMEM limit sized to the double-buffered block (+ headroom); the
    # defaults (16 MiB v5e / 32 MiB v6e,v7x) are too small for multi-MB blocks.
    est_bytes = (2 * c_pad * chunk * dtype_bytes          # x double buffer
                 + _round_up(C, 8) * 128 * 4              # f32 accumulator
                 + (2 << 20))                             # weights/out/misc
    vmem_limit = int(min(int(vmem_cap * 0.9),
                         max(32 << 20, int(est_bytes * 1.5))))

    cost = pl.CostEstimate(
        flops=B * C * hw_pad + 2 * B * (C * hid + hid * two_k),
        transcendentals=B * two_k,
        bytes_accessed=B * C * hw_pad * dtype_bytes
        + 4 * (C * hid + hid + hid * two_k + two_k + B * two_k),
    )

    out = pl.pallas_call(
        kernel,
        out_shape=jax.ShapeDtypeStruct((B, 1, two_k), jnp.float32),
        grid_spec=pltpu.PrefetchScalarGridSpec(
            num_scalar_prefetch=0,
            grid=(B, n_chunks),
            in_specs=[
                pl.BlockSpec((1, C, chunk), lambda b, j: (b, 0, j)),
                pl.BlockSpec((C, hid), lambda b, j: (0, 0)),
                pl.BlockSpec((1, hid), lambda b, j: (0, 0)),
                pl.BlockSpec((hid, two_k), lambda b, j: (0, 0)),
                pl.BlockSpec((1, two_k), lambda b, j: (0, 0)),
            ],
            out_specs=pl.BlockSpec((1, 1, two_k), lambda b, j: (b, 0, 0)),
            scratch_shapes=[pltpu.VMEM((1, C, 128), jnp.float32)],
        ),
        compiler_params=pltpu.CompilerParams(
            dimension_semantics=("parallel", "arbitrary"),
            vmem_limit_bytes=vmem_limit,
        ),
        cost_estimate=cost,
    )(x3, w1t, b1r, w2t, b2r)
    return out.reshape(B, two_k)


def dyrelu_get_relu_coefs_ref(x, w1, b1, w2, b2):
    theta = jnp.mean(jnp.mean(x.astype(jnp.float32), axis=-1), axis=-1)
    h = jnp.maximum(theta @ w1.T + b1, 0.0)
    t = h @ w2.T + b2
    return 2.0 * jax.nn.sigmoid(t) - 1.0


if __name__ == "__main__":
    # Module hyper-params (small, consistent with DyReLU.__init__).
    channels, reduction, k = 8, 4, 2
    hidden = channels // reduction          # 2
    two_k = 2 * k                           # 4
    B, H, W = 2, 16, 16                     # H*W = 256

    key = jax.random.PRNGKey(0)
    kx, k1, k2, k3, k4 = jax.random.split(key, 5)

    # Deterministic synthetic parameters (PyTorch Linear shapes: [out, in]).
    x = jax.random.normal(kx, (B, channels, H, W), dtype=jnp.float32)
    w1 = jax.random.normal(k1, (hidden, channels), dtype=jnp.float32) * 0.1
    b1 = jax.random.normal(k2, (hidden,), dtype=jnp.float32) * 0.1
    w2 = jax.random.normal(k3, (two_k, hidden), dtype=jnp.float32) * 0.1
    b2 = jax.random.normal(k4, (two_k,), dtype=jnp.float32) * 0.1

    # Registered buffers (unused by the base-module compute; kept for fidelity).
    lambdas = jnp.array([1.0] * k + [0.5] * k, dtype=jnp.float32)
    init_v = jnp.array([1.0] + [0.0] * (2 * k - 1), dtype=jnp.float32)

    ref = dyrelu_get_relu_coefs_ref(x, w1, b1, w2, b2)

    # (1) f32 input, forced multi-chunk grid (exercises init/accumulate/finalize).
    out = jax.block_until_ready(dyrelu_get_relu_coefs(x, w1, b1, w2, b2, chunk=128))
    assert out.shape == (B, two_k)
    assert jnp.allclose(out, ref, atol=1e-5, rtol=1e-5)

    # (2) Auto VMEM-budgeted chunk + native bf16 input (kernel accumulates in f32).
    out_bf16 = jax.block_until_ready(
        dyrelu_get_relu_coefs(x.astype(jnp.bfloat16), w1, b1, w2, b2))
    assert jnp.allclose(out_bf16, ref, atol=2e-2, rtol=2e-2)

    # (3) H*W not a multiple of 128 (exercises the sum-neutral zero-pad path).
    xp = jax.random.normal(kx, (B, channels, 9, 14), dtype=jnp.float32)
    refp = dyrelu_get_relu_coefs_ref(xp, w1, b1, w2, b2)
    outp = jax.block_until_ready(dyrelu_get_relu_coefs(xp, w1, b1, w2, b2))
    assert jnp.allclose(outp, refp, atol=1e-5, rtol=1e-5)

    print("KERNEL_OK")
</pallas_src>

<mosaic_0001>
module attributes {stable_mosaic.version = 11 : i64} {
  func.func @_dyrelu_coefs_kernel(%arg0: i32, %arg1: i32, %arg2: memref<1x8x128xf32, #tpu.memory_space<vmem>>, %arg3: memref<8x2xf32, #tpu.memory_space<vmem>>, %arg4: memref<1x2xf32, #tpu.memory_space<vmem>>, %arg5: memref<2x4xf32, #tpu.memory_space<vmem>>, %arg6: memref<1x4xf32, #tpu.memory_space<vmem>>, %arg7: memref<1x1x4xf32, #tpu.memory_space<vmem>>, %arg8: memref<1x8x128xf32, #tpu.memory_space<vmem>>) attributes {dimension_semantics = [#tpu.dimension_semantics<parallel>, #tpu.dimension_semantics<arbitrary>], iteration_bounds = array<i64: 2, 2>, scalar_prefetch = 0 : i64, scratch_operands = 1 : i64, tpu.core_type = #tpu.core_type<tc>, window_params = [{transform_indices = @transform_0, window_bounds = array<i64: 1, 8, 128>}, {pipeline_mode = #tpu.pipeline_mode<synchronous>, transform_indices = @transform_1, window_bounds = array<i64: 8, 2>}, {pipeline_mode = #tpu.pipeline_mode<synchronous>, transform_indices = @transform_2, window_bounds = array<i64: 1, 2>}, {pipeline_mode = #tpu.pipeline_mode<synchronous>, transform_indices = @transform_3, window_bounds = array<i64: 2, 4>}, {pipeline_mode = #tpu.pipeline_mode<synchronous>, transform_indices = @transform_4, window_bounds = array<i64: 1, 4>}, {transform_indices = @transform_5, window_bounds = array<i64: 1, 1, 4>}]} {
    %c0_i32 = arith.constant 0 : i32
    %0 = arith.cmpi eq, %arg1, %c0_i32 : i32
    %1 = arith.extui %0 : i1 to i32
    %c0_i32_0 = arith.constant 0 : i32
    %2 = arith.cmpi ne, %1, %c0_i32_0 : i32
    scf.if %2 {
      %cst = arith.constant 0.000000e+00 : f32
      %13 = vector.broadcast %cst : f32 to vector<1x8x128xf32>
      %c0_11 = arith.constant 0 : index
      %c0_12 = arith.constant 0 : index
      %c0_13 = arith.constant 0 : index
      %14 = vector.load %arg8[%c0_11, %c0_12, %c0_13] : memref<1x8x128xf32, #tpu.memory_space<vmem>>, vector<1x8x128xf32>
      tpu.vector_store %arg8[%c0_11, %c0_12, %c0_13], %13 {strides = array<i32>} : memref<1x8x128xf32, #tpu.memory_space<vmem>>, vector<1x8x128xf32>,
    } else {
    }
    %c0_i32_1 = arith.constant 0 : i32
    %c128_i32 = arith.constant 128 : i32
    %3 = arith.muli %c0_i32_1, %c128_i32 : i32
    %4 = tpu.assume_multiple %3, 128 : i32
    %c0 = arith.constant 0 : index
    %c0_2 = arith.constant 0 : index
    %c0_3 = arith.constant 0 : index
    %5 = vector.load %arg8[%c0, %c0_2, %c0_3] : memref<1x8x128xf32, #tpu.memory_space<vmem>>, vector<1x8x128xf32>
    %c0_4 = arith.constant 0 : index
    %c0_5 = arith.constant 0 : index
    %6 = arith.index_cast %4 : i32 to index
    %7 = vector.load %arg2[%c0_4, %c0_5, %6] : memref<1x8x128xf32, #tpu.memory_space<vmem>>, vector<1x8x128xf32>
    %8 = arith.addf %5, %7 : vector<1x8x128xf32>
    %c0_6 = arith.constant 0 : index
    %c0_7 = arith.constant 0 : index
    %c0_8 = arith.constant 0 : index
    %9 = vector.load %arg8[%c0_6, %c0_7, %c0_8] : memref<1x8x128xf32, #tpu.memory_space<vmem>>, vector<1x8x128xf32>
    tpu.vector_store %arg8[%c0_6, %c0_7, %c0_8], %8 {strides = array<i32>} : memref<1x8x128xf32, #tpu.memory_space<vmem>>, vector<1x8x128xf32>,
    %c1_i32 = arith.constant 1 : i32
    %c1_i32_9 = arith.constant 1 : i32
    %10 = arith.cmpi eq, %arg1, %c1_i32_9 : i32
    %11 = arith.extui %10 : i1 to i32
    %c0_i32_10 = arith.constant 0 : i32
    %12 = arith.cmpi ne, %11, %c0_i32_10 : i32
    scf.if %12 {
      %c0_11 = arith.constant 0 : index
      %c0_12 = arith.constant 0 : index
      %c0_13 = arith.constant 0 : index
      %13 = vector.load %arg8[%c0_11, %c0_12, %c0_13] : memref<1x8x128xf32, #tpu.memory_space<vmem>>, vector<1x8x128xf32>
      %cst = arith.constant dense<0.000000e+00> : vector<1x8xf32>
      %14 = vector.multi_reduction <add>, %13, %cst [2] : vector<1x8x128xf32> to vector<1x8xf32>
      %cst_14 = arith.constant 3.906250e-03 : f32
      %15 = vector.broadcast %cst_14 : f32 to vector<1x8xf32>
      %16 = arith.mulf %14, %15 : vector<1x8xf32>
      %c0_15 = arith.constant 0 : index
      %c0_16 = arith.constant 0 : index
      %17 = vector.load %arg3[%c0_15, %c0_16] : memref<8x2xf32, #tpu.memory_space<vmem>>, vector<8x2xf32>
      %cst_17 = arith.constant dense<0.000000e+00> : vector<1x2xf32>
      %18 = tpu.matmul %16, %17, %cst_17 {dimension_numbers = #tpu.dot_dimension_numbers<[1], [0], [0], [1], [0, 0, 1, 1], [], []>} : vector<1x8xf32>, vector<8x2xf32>, vector<1x2xf32> -> vector<1x2xf32>
      %c0_18 = arith.constant 0 : index
      %c0_19 = arith.constant 0 : index
      %19 = vector.load %arg4[%c0_18, %c0_19] : memref<1x2xf32, #tpu.memory_space<vmem>>, vector<1x2xf32>
      %20 = arith.addf %18, %19 : vector<1x2xf32>
      %cst_20 = arith.constant 0.000000e+00 : f32
      %21 = vector.broadcast %cst_20 : f32 to vector<1x2xf32>
      %22 = arith.maximumf %20, %21 : vector<1x2xf32>
      %c0_21 = arith.constant 0 : index
      %c0_22 = arith.constant 0 : index
      %23 = vector.load %arg5[%c0_21, %c0_22] : memref<2x4xf32, #tpu.memory_space<vmem>>, vector<2x4xf32>
      %cst_23 = arith.constant dense<0.000000e+00> : vector<1x4xf32>
      %24 = tpu.matmul %22, %23, %cst_23 {dimension_numbers = #tpu.dot_dimension_numbers<[1], [0], [0], [1], [0, 0, 1, 1], [], []>} : vector<1x2xf32>, vector<2x4xf32>, vector<1x4xf32> -> vector<1x4xf32>
      %c0_24 = arith.constant 0 : index
      %c0_25 = arith.constant 0 : index
      %25 = vector.load %arg6[%c0_24, %c0_25] : memref<1x4xf32, #tpu.memory_space<vmem>>, vector<1x4xf32>
      %26 = arith.addf %24, %25 : vector<1x4xf32>
      %cst_26 = arith.constant 5.000000e-01 : f32
      %27 = vector.broadcast %cst_26 : f32 to vector<1x4xf32>
      %28 = arith.mulf %27, %26 : vector<1x4xf32>
      %29 = math.tanh %28 : vector<1x4xf32>
      %30 = vector.shape_cast %29 : vector<1x4xf32> to vector<1x1x4xf32>
      %c0_27 = arith.constant 0 : index
      %c0_28 = arith.constant 0 : index
      %c0_29 = arith.constant 0 : index
      %31 = vector.load %arg7[%c0_27, %c0_28, %c0_29] : memref<1x1x4xf32, #tpu.memory_space<vmem>>, vector<1x1x4xf32>
      tpu.vector_store %arg7[%c0_27, %c0_28, %c0_29], %30 {strides = array<i32>} : memref<1x1x4xf32, #tpu.memory_space<vmem>>, vector<1x1x4xf32>,
    } else {
    }
    return
  }
  func.func @transform_0(%arg0: i32, %arg1: i32) -> (i32, i32, i32) {
    %c0_i32 = arith.constant 0 : i32
    %c0_i32_0 = arith.constant 0 : i32
    return %arg0, %c0_i32, %arg1 : i32, i32, i32
  }
  func.func @transform_1(%arg0: i32, %arg1: i32) -> (i32, i32) {
    %c0_i32 = arith.constant 0 : i32
    %c0_i32_0 = arith.constant 0 : i32
    %c0_i32_1 = arith.constant 0 : i32
    return %c0_i32, %c0_i32_0 : i32, i32
  }
  func.func @transform_2(%arg0: i32, %arg1: i32) -> (i32, i32) {
    %c0_i32 = arith.constant 0 : i32
    %c0_i32_0 = arith.constant 0 : i32
    %c0_i32_1 = arith.constant 0 : i32
    return %c0_i32, %c0_i32_0 : i32, i32
  }
  func.func @transform_3(%arg0: i32, %arg1: i32) -> (i32, i32) {
    %c0_i32 = arith.constant 0 : i32
    %c0_i32_0 = arith.constant 0 : i32
    %c0_i32_1 = arith.constant 0 : i32
    return %c0_i32, %c0_i32_0 : i32, i32
  }
  func.func @transform_4(%arg0: i32, %arg1: i32) -> (i32, i32) {
    %c0_i32 = arith.constant 0 : i32
    %c0_i32_0 = arith.constant 0 : i32
    %c0_i32_1 = arith.constant 0 : i32
    return %c0_i32, %c0_i32_0 : i32, i32
  }
  func.func @transform_5(%arg0: i32, %arg1: i32) -> (i32, i32, i32) {
    %c0_i32 = arith.constant 0 : i32
    %c0_i32_0 = arith.constant 0 : i32
    %c0_i32_1 = arith.constant 0 : i32
    return %arg0, %c0_i32, %c0_i32_0 : i32, i32, i32
  }
}

</mosaic_0001>

<bundles_post_ra>
// kernel: tpu_custom_call.1
= control target key start
LH: loop header
LB: loop body
LE: loop exit
PB: predicated region body
PF: predicated region fallthrough
CT: control target
= control target key end

     0   :  { %s1056_s0 = inlined_call_operand.hbm [shape: f32[2,8,256], index: 0, kind: input, shape index: {}]   ;;  %s1057_s1 = inlined_call_operand.vmem [shape: f32[8,2], index: 1, kind: input, shape index: {}]   ;;  %s1058_s2 = inlined_call_operand.vmem [shape: f32[1,2], index: 2, kind: input, shape index: {}]   ;;  %s1059_s3 = inlined_call_operand.vmem [shape: f32[2,4], index: 3, kind: input, shape index: {}]   ;;  %s1060_s4 = inlined_call_operand.vmem [shape: f32[1,4], index: 4, kind: input, shape index: {}]   ;;  %s1061_s5 = inlined_call_operand.hbm [shape: f32[2,1,4], index: 5, kind: output, shape index: {}]  }
   0x1   :  { %1065 = sst [smem:[#allocation13_spill]] %s1061_s5 }
   0x2   :  { %10 = vsyncpa [#allocation4], 0 }
   0x3   :  { %12 = vsyncpa [#allocation4 + $0x1], 0 }
   0x4   :  { %13 = vsyncpa [#allocation5], 0 }
   0x5   :  { %15 = vsyncpa [#allocation5 + $0x1], 0  ;;  %s854_s18 = smov 0   ;;  %s856_s19 = smov 0  }
   0x6   :  { %s858_s20 = smov 0   ;;  %s860_s21 = smov 0  }
   0x7   :  { %s862_s22 = smov 0   ;;  %s864_s23 = smov 0  }
   0x8   :  { %s866_s24 = smov 0   ;;  %s868_s25 = smov 0  }
   0x9   :  { %s870_s26 = smov 0   ;;  %s872_s27 = smov 0  }
   0xa   :  { %s874_s28 = smov 0  }
   0xb LB: > { %s531_s29 = sadd.s32 4294967295, %s817_s28   ;;  %s532_s30 = sadd.s32 4294967294, %s817_s28   ;;  %s817_s28 = sphi %s874_s28, %s21_s28   ;;  %s813_s27 = sphi %s872_s27, %s1090_s27   ;;  %s809_s26 = sphi %s870_s26, %s1089_s26   ;;  %s805_s25 = sphi %s868_s25, %s1088_s25   ;;  %s801_s24 = sphi %s866_s24, %s1087_s24   ;;  %s797_s23 = sphi %s864_s23, %s1086_s23   ;;  %s793_s22 = sphi %s862_s22, %s1085_s22   ;;  %s789_s21 = sphi %s860_s21, %s1084_s21   ;;  %s785_s20 = sphi %s858_s20, %s1083_s20   ;;  %s781_s19 = sphi %s856_s19, %s1082_s19   ;;  %s777_s18 = sphi %s854_s18, %s1081_s18  }
   0xc   : > { %s30_s6 = sadd.s32 1, %s809_s26  ;;  %s33_s7 = sadd.s32 1, %s813_s27 }
   0xd   : > { %p31_p0 = scmp.ge.s32.totalorder %s30_s6, 2  ;;  %s42_s8 = sadd.s32 1, %s797_s23 }
   0xe   : > { %p49_p1 = scmp.ne.s32.totalorder %s797_s23, %s793_s22  ;;  %p50_p2 = scmp.eq.s32.totalorder %s817_s28, 0 }
   0xf   : > { %s1092_s6 = smov (%p31_p0, %s30_s6), 0  ;;  %s1094_s7 = smov (!%p31_p0, %s33_s7), %s813_s27 }
  0x10   : > { %1066 = sst [smem:[#allocation9_spill]] %s1092_s6  ;;  %s38_s9 = ssub.s32 %s809_s26, %s1092_s6 }
  0x11   : > { %p920_p3 = por %p50_p2, %p49_p1  ;;  %p35_p4 = scmp.ge.s32.totalorder %s1094_s7, 2 }
  0x12   : > { %p55_p5 = scmp.ne.s32.totalorder %s793_s22, %s789_s21  ;;  %p56_p6 = scmp.eq.s32.totalorder %s531_s29, 0 }
  0x13   : > { %s152_s11 = sadd.s32 1, %s785_s20  ;;  %s1096_s7 = smov (%p35_p4, %s1094_s7), 0 }
  0x14   : > { %1068 = sst [smem:[#allocation10_spill]] %s1096_s7  ;;  %p928_p7 = por %p56_p6, %p55_p5 }
  0x15   : > { %p162_p8 = scmp.ne.s32.totalorder %s785_s20, %s781_s19  ;;  %s37_s13 = ssub.s32 %s813_s27, %s1096_s7 }
  0x16   : > { %p163_p9 = scmp.eq.s32.totalorder %s531_s29, 3  ;;  %s39_s14 = sor.u32 %s38_s9, %s37_s13 }
  0x17   : > { %p150_p10 = scmp.eq.s32.totalorder %s37_s13, 0  ;;  %p40_p11 = scmp.eq.s32.totalorder %s39_s14, 0 }
  0x18   : > { %p936_p12 = por %p163_p9, %p162_p8  ;;  %p168_p13 = scmp.ne.s32.totalorder %s781_s19, %s777_s18 }
  0x19   : > { %s941_s16 = scalar_select %p150_p10, %s785_s20, %s152_s11  }
  0x1a   : > { %s944_s17 = scalar_select %p40_p11, %s797_s23, %s42_s8  }
  0x1b   : > { %1071 = sst [smem:[#allocation11_spill]] %s941_s16  ;;  %p169_p0 = scmp.eq.s32.totalorder %s532_s30, 3 }
  0x1c   : > { %1072 = sst [smem:[#allocation12_spill]] %s944_s17  ;;  %p574_p1 = scmp.lt.s32.totalorder %s817_s28, 4 }
  0x1d   : > { %p949_p2 = por %p169_p0, %p168_p13  ;;  %s201_s29 = sand.u32 1, %s797_s23  }
  0x1e   : > { %s535_s9 = sshll.u32 %s201_s29, 3  ;;  %s536_s13 = sshll.u32 %s813_s27, 1 }
  0x1f   : > { %s1073_s21 = scalar_select %p949_p2, 1, 0 }
  0x20   : > { %s210_s14 = sadd.s32 %s809_s26, %s536_s13  ;;  %s205_s7 = scalar_lea.vmem [#allocation3], %s535_s9 }
  0x21   : > { %s214_s6 = sshll.u32 %s205_s7, 4  ;;  %s537_s5 = sshll.u32 %s210_s14, 7  ;;  %s215_s6 = int_to_ptr.vmem [resolvable:$true] %s214_s6 }
  0x22   : > { %s212_s8 = scalar_lea.hbm %s1056_s0, %s537_s5  ;;  %p961_p4 = pnand %p574_p1, %p920_p3 }
  0x23   : > { %p538_p5 = scmp.ge.s32.totalorder %s817_s28, 1  ;;  %p219_p6 = scmp.lt.s32.totalorder %s817_s28, 5 }
  0x24   : > { %s202_s17 = scalar_lea.sflag [#allocation4], %s201_s29  ;;  %p671_p8 = pneg %p961_p4 }
  0x25   : > { %s682_s13 = scalar_lea.vmem %s215_s6, 128  ;;  %s819_s7 = smov [#allocation3]  }
  0x26   : > { %p683_p9 = scmp.ne.s32.totalorder %s215_s6, %s682_s13  ;;  %s687_s9 = sshll.u32 %s819_s7, 4  ;;  %s688_s9 = int_to_ptr.vmem [resolvable:$false] %s687_s9 }
  0x27   : > { %s689_s16 = scalar_lea.vmem %s688_s9, 256  ;;  %p690_p13 = scmp.lt.s32.totalorder %s215_s6, %s688_s9 }
  0x28   : > { %p685_p10 = pnand %p683_p9, %p671_p8  ;;  %p691_p0 = scmp.lt.s32.totalorder %s689_s16, %s682_s13 }
  0x2a   : > { %p686_p11 = pneg %p685_p10  ;;  %p692_p3 = por %p691_p0, %p690_p13 }
  0x2c   : > { %p693_p1 = pnand %p692_p3, %p686_p11 }
  0x2e   : > { %696 = shalt.err (!%p693_p1)
}
  0x2f   : > { %569 = dma.hbm_to_vmem [thread:$0]  (!%p961_p4), %s212_s8, 128, %s215_s6, %s202_s17  }
  0x30   : > { %p220_p2 = pnand %p538_p5, %p219_p6 }
  0x31   : > { %s225_s5 = sand.u32 (!%p220_p2), 1, %s793_s22  }
  0x32   : > { %223 = sbr.rel (%p220_p2) target bundleno = 656 (0x290), region = 40  ;;  %s539_s10 = sshll.u32 (!%p220_p2), %s225_s5, 3 }
  0x33   : > { %s226_s29 = scalar_lea.sflag (!%p220_p2), [#allocation4], %s225_s5  ;;  %s229_s14 = scalar_lea.vmem (!%p220_p2), [#allocation3], %s539_s10 }
  0x37   : > { %768 = dma.done.wait (%p928_p7), %s226_s29, 128  }
  0x38   : > { %770 = vsyncadd (%p928_p7), %s226_s29, 4294967168  ;;  %s253_s11 = sand.u32 1, %s781_s19   ;;  %p540_p4 = scmp.ne.s32.totalorder %s801_s24, 0 }
  0x39   : > { %s983_s6 = scalar_lea.vmem [#allocation6], %s253_s11 }
  0x3a   : > { %258 = sbr.rel (%p540_p4) target bundleno = 65 (0x41), region = 48 }
  0x3f   : > { %v820_v0 = vmov 0.0  }
  0x40   : > { %259 = vst [vmem:[#allocation2] sm:$0xff] %v820_v0 }
  0x41 PF: > { %v261_v2 = vld [vmem:[%s229_s14] sm:$0xff]  ;;  %p541_p2 = scmp.ne.s32.totalorder %s801_s24, 1 }
  0x46   : > { %267 = sbr.rel (%p541_p2) target bundleno = 633 (0x279), region = 52 }
  0x47   : > { %v260_v1 = vld [vmem:[#allocation2] sm:$0xff] }
  0x48   : > { %v262_v3 = vadd.f32 %v261_v2, %v260_v1 }
  0x4a   : > { %263 = vst [vmem:[#allocation2] sm:$0xff] %v262_v3 }
  0x4b   : > { %v821_v5 = vmov 0.0   ;;  %v272_v6 = vld [vmem:[%s1057_s1] sm:$0xff]  ;;  %vm822_vm0 = vmmov 0   ;;  %v275_v7 = vlaneseq  ;;  %vm281_vm1 = vcmask 64512  }
  0x4c   : > { %552 = vmatprep.subr.mxu0 %v821_v5  ;;  %557 = vmatprep.subr.mxu1 %v821_v5  ;;  %v355_v14 = vld [vmem:[%s1059_s3] sm:$0x3]  ;;  %vm361_vm2 = vcmask 1041408   ;;  %vm357_vm3 = vcmask 15360   ;;  %vm437_vm4 = vcmask 24576  }
  0x4d   : > { %553 = vmatpush3.msra.mxu0 %v272_v6  ;;  %554 = vmatprep.mubr.msk.f32.mxu0 %vm822_vm0, %v821_v5  ;;  %v276_v8 = vand.u32 127, %v275_v7  ;;  %v278_v9 = vshrl.u32 %v275_v7, 7  ;;  %v273_v15 = vld [vmem:[%s1058_s2] sm:$0x1] }
  0x4e   : > { %559 = vmatprep.mubr.msk.f32.mxu1 %vm822_vm0, %v821_v5  ;;  %558 = vmatpush3.msk.msra.mxu1 %vm361_vm2, %v355_v14  ;;  %v356_v20 = vld [vmem:[%s1060_s4] sm:$0x1] }
  0x4f   : > { %v279_v10 = vsub.s32 %v276_v8, %v278_v9 }
  0x51   : > { %v268_v4 = vld [vmem:[#allocation2] sm:$0xff] }
  0x52   : > { %269 = vadd.xlane.f32.xlu0 %v268_v4 }
  0xdb   : > { %v270_v11 = vpop.xlane.xlu0 %269 }
  0xdc   : > { %v271_v12 = vmul.f32 0.00390625, %v270_v11 }
  0xde   : > { %v280_v13 = vrot.slane %v271_v12, %v279_v10 }
  0xe0   : > { %555 = vmatmul.mubr.msk.f32.vlgmr.msra.gmra.mxu0 %vm281_vm1, %v280_v13 }
 0x1a0   : > { %v350_v16 = vpop.f32.mrf.mxu0 }
 0x1a1   : > { %v351_v17 = vadd.f32 %v350_v16, %v273_v15 }
 0x1a2   : > { %v556_v18 = vpop.f32.mrf.mxu0 }
 0x1a3   : > { %v354_v19 = vmax.f32 %v351_v17, 0.0 }
 0x1a5   : > { %560 = vmatmul.mubr.msk.f32.vlgmr.msra.gmra.mxu1 %vm357_vm3, %v354_v19 }
 0x265   : > { %v431_v21 = vpop.f32.mrf.mxu1 }
 0x266   : > { %v432_v22 = vadd.f32 %v431_v21, %v356_v20 }
 0x267   : > { %v561_v23 = vpop.f32.mrf.mxu1 }
 0x268   : > { %v435_v24 = vmul.f32 0.5, %v432_v22 }
 0x26a   : > { %667 = vtanh.f32 %v435_v24 }
 0x277   : > { %v668_v25 = vpop.eup %667 }
 0x278   : > { %438 = vst.msk [vmem:[%s983_s6] sm:$0x1] %vm437_vm4, %v668_v25 }
 0x279 PF: > { %s545_s16 = sshll.u32 %s805_s25, 4  ;;  %s1075_s29 = sld [smem:[#allocation13_spill]] }
 0x27a   : > { %s452_s12 = sshll.u32 %s983_s6, 4  ;;  %s440_s17 = scalar_lea.sflag [#allocation5], %s253_s11  ;;  %s453_s12 = int_to_ptr.vmem [resolvable:$true] %s452_s12 }
 0x27b   : > { %s697_s24 = scalar_lea.vmem %s453_s12, 16  ;;  %s823_s8 = smov [#allocation6]  }
 0x27c   : > { %p698_p7 = scmp.ne.s32.totalorder %s453_s12, %s697_s24  ;;  %s701_s30 = sshll.u32 %s823_s8, 4  ;;  %s702_s30 = int_to_ptr.vmem [resolvable:$false] %s701_s30 }
 0x27d   : > { %s703_s13 = scalar_lea.vmem %s702_s30, 32  ;;  %p704_p8 = scmp.lt.s32.totalorder %s453_s12, %s702_s30 }
 0x27e   : > { %p699_p5 = pnand %p698_p7, %p936_p12  ;;  %p705_p9 = scmp.lt.s32.totalorder %s703_s13, %s697_s24 }
 0x27f   : > { %s450_s14 = scalar_lea.hbm %s1075_s29, %s545_s16 }
 0x280   : > { %p700_p6 = pneg %p699_p5  ;;  %p706_p10 = por %p705_p9, %p704_p8 }
 0x282   : > { %p707_p11 = pnand %p706_p10, %p700_p6 }
 0x284   : > { %710 = shalt.err (!%p707_p11)
}
 0x285   : > { %s711_s25 = scalar_lea.hbm %s450_s14, 16  ;;  %s715_s7 = scalar_lea.hbm %s1075_s29, 32 }
 0x286   : > { %p712_p13 = scmp.ne.s32.totalorder %s450_s14, %s711_s25  ;;  %p716_p1 = scmp.lt.s32.totalorder %s450_s14, %s1075_s29 }
 0x287   : > { %p717_p4 = scmp.lt.s32.totalorder %s715_s7, %s711_s25 }
 0x288   : > { %p713_p0 = pnand %p712_p13, %p936_p12 }
 0x289   : > { %p718_p2 = por %p717_p4, %p716_p1 }
 0x28a   : > { %p714_p3 = pneg %p713_p0 }
 0x28c   : > { %p719_p7 = pnand %p718_p2, %p714_p3 }
 0x28e   : > { %722 = shalt.err (!%p719_p7)
}
 0x28f   : > { %564 = dma.vmem_to_hbm [thread:$0]  (%p936_p12), %s453_s12, 16, %s450_s14, %s440_s17  }
 0x290 PF: > { %p575_p5 = scmp.ge.s32.totalorder %s817_s28, 2  ;;  %s464_s5 = sand.u32 1, %s777_s18  }
 0x291   : > { %p1076_p6 = scmp.ne.s32.totalorder %s1073_s21, 0  ;;  %s465_s10 = scalar_lea.sflag [#allocation5], %s464_s5 }
 0x293   : > { %p571_p8 = pnand %p575_p5, %p1076_p6 }
 0x295   : > { %p572_p9 = pneg %p571_p8 }
 0x297   : > { %772 = dma.done.wait (%p572_p9), %s465_s10, 16  }
 0x298   : > { %774 = vsyncadd (%p572_p9), %s465_s10, 4294967280  ;;  %s21_s28 = sadd.s32 1, %s817_s28   ;;  %s1077_s24 = sld [smem:[#allocation11_spill]] }
 0x299   : > { %p18_p10 = scmp.ge.s32.totalorder %s21_s28, 6   ;;  %s1078_s15 = sld [smem:[#allocation12_spill]] }
 0x29a   : > { %s1079_s14 = sld [smem:[#allocation9_spill]]  ;;  %s1081_s18 = smov %s781_s19 }
 0x29b   : > { %s1080_s12 = sld [smem:[#allocation10_spill]]  ;;  %s1082_s19 = smov %s785_s20 }
 0x29c   : > { %s1084_s21 = smov %s793_s22  ;;  %s1085_s22 = smov %s797_s23 }
 0x29d   : > { %s1088_s25 = smov %s813_s27  ;;  %20 = sbr.rel (!%p18_p10) target bundleno = 11 (0xb), region = 93 }
 0x29e   : > { %s1083_s20 = smov %s1077_s24  ;;  %s1087_s24 = smov %s809_s26 }
 0x29f   : > { %s1086_s23 = smov %s1078_s15 }
 0x2a0   : > { %s1089_s26 = smov %s1079_s14 }
 0x2a1   : > { %s1090_s27 = smov %s1080_s12 }
 0x2a2   :  { %469 = vsyncpa [#allocation4], 1 }
 0x2a3   :  { %471 = vsyncpa [#allocation4 + $0x1], 1 }
 0x2a4   :  { %472 = vsyncpa [#allocation5], 1 }
 0x2a5   :  { %474 = vsyncpa [#allocation5 + $0x1], 1 }

</bundles_post_ra>
